<compile_context>
chip_gen: v7x
topology: tpu7x:2x2x1
jax: 0.10.0
libtpu: 0.0.40
codegen_flags: <defaults>
</compile_context>

<pallas_src>
import jax
import jax.numpy as jnp
from jax.experimental import pallas as pl
from jax.experimental.pallas import tpu as pltpu


def _round_up(x: int, m: int) -> int:
    return ((x + m - 1) // m) * m


# ---------------- Pass 1: streaming spatial sum (squeeze) ----------------
def _pool_sum_kernel(x_ref, sum_ref):
    # x_ref: (TR, TL); sum_ref: (TR, 1) f32, resident across the HW axis.
    @pl.when(pl.program_id(1) == 0)
    def _():
        sum_ref[...] = jnp.zeros_like(sum_ref)

    sum_ref[...] += jnp.sum(x_ref[...].astype(jnp.float32), axis=-1, keepdims=True)


# ---------------- Pass 2: tiny excitation MLP (runs once) ----------------
def _excite_kernel(p_ref, w1_ref, w2_ref, g_ref):
    # p_ref: (B, C) pooled means; w1: (C, rd); w2: (rd, C); g_ref: (B, C)
    pooled = p_ref[...]
    h = jnp.dot(pooled, w1_ref[...], preferred_element_type=jnp.float32)
    h = jnp.maximum(h, 0.0)
    z = jnp.dot(h, w2_ref[...], preferred_element_type=jnp.float32)
    g_ref[...] = jax.nn.sigmoid(z)


# ---------------- Pass 3: streaming per-channel scale ----------------
def _scale_kernel(x_ref, g_ref, o_ref):
    # x_ref: (TR, TL); g_ref: (TR, 1) f32; o_ref: (TR, TL)
    o_ref[...] = (x_ref[...].astype(jnp.float32) * g_ref[...]).astype(o_ref.dtype)


def se_forward(x, w1, w2, *, lane_cap=4096, block_bytes=2 * 1024 * 1024,
               vmem_limit_bytes=32 * 1024 * 1024):
    """x: (B, C, H, W); w1: (C, rd); w2: (rd, C). Returns (B, C, H, W)."""
    B, C, H, W = x.shape
    BC, HW = B * C, H * W
    dtype = x.dtype
    itemsize = jnp.dtype(dtype).itemsize

    # Lane tile: multiple of 128. Take the whole 128-padded spatial axis when it
    # is modest (no padded traffic); otherwise stream it in lane_cap chunks.
    lane_cap = max(128, (lane_cap // 128) * 128)
    hw128 = _round_up(HW, 128)
    tl = min(hw128, lane_cap)
    hw_pad = _round_up(hw128, tl)

    # Row (sublane) tile: multiple of 8, sized so each x block is ~block_bytes.
    tr = max(8, min(_round_up(BC, 8),
                    (block_bytes // (tl * itemsize) // 8) * 8))
    bc_pad = _round_up(BC, tr)

    # Lane-dense 2-D view of x, zero-padded to the tile grid.
    x2p = jnp.pad(x.reshape(BC, HW), ((0, bc_pad - BC), (0, hw_pad - HW)))

    grid = (bc_pad // tr, hw_pad // tl)
    cparams = pltpu.CompilerParams(
        dimension_semantics=("parallel", "arbitrary"),
        vmem_limit_bytes=vmem_limit_bytes,
    )

    # ---- Pass 1: global sum over the spatial (lane) axis ----
    sums = pl.pallas_call(
        _pool_sum_kernel,
        out_shape=jax.ShapeDtypeStruct((bc_pad, 1), jnp.float32),
        grid=grid,
        in_specs=[pl.BlockSpec((tr, tl), lambda i, k: (i, k))],
        out_specs=pl.BlockSpec((tr, 1), lambda i, k: (i, 0)),
        compiler_params=cparams,
    )(x2p)

    # ---- Pass 2: tiny excitation MLP (hoisted out of the x stream) ----
    pooled = (sums[:BC, 0] * (1.0 / HW)).reshape(B, C).astype(jnp.float32)
    gates = pl.pallas_call(
        _excite_kernel,
        out_shape=jax.ShapeDtypeStruct((B, C), jnp.float32),
        in_specs=[pl.BlockSpec(memory_space=pltpu.MemorySpace.VMEM)] * 3,
        out_specs=pl.BlockSpec(memory_space=pltpu.MemorySpace.VMEM),
    )(pooled, w1.astype(jnp.float32), w2.astype(jnp.float32))

    # ---- Pass 3: stream x and apply the per-(batch, channel) gate ----
    gates2 = jnp.pad(gates.reshape(BC, 1), ((0, bc_pad - BC), (0, 0)))
    out2 = pl.pallas_call(
        _scale_kernel,
        out_shape=jax.ShapeDtypeStruct((bc_pad, hw_pad), dtype),
        grid=grid,
        in_specs=[
            pl.BlockSpec((tr, tl), lambda i, k: (i, k)),
            pl.BlockSpec((tr, 1), lambda i, k: (i, 0)),
        ],
        out_specs=pl.BlockSpec((tr, tl), lambda i, k: (i, k)),
        compiler_params=cparams,
    )(x2p, gates2)

    return out2[:BC, :HW].reshape(B, C, H, W)


def make_se_params(channels, rd_ratio=1.0 / 16.0, key=None):
    """Synthetic params matching nn.Linear(bias=False) shapes.

    PyTorch: fc[0].weight is (rd, C), fc[2].weight is (C, rd); Linear computes
    x @ W.T, so we store the transposed versions directly: w1 (C, rd), w2 (rd, C).
    """
    rd_channels = max(8, int(channels * rd_ratio))
    if key is None:
        key = jax.random.PRNGKey(0)
    k1, k2 = jax.random.split(key)
    w1 = jax.random.normal(k1, (channels, rd_channels), jnp.float32) * 0.1
    w2 = jax.random.normal(k2, (rd_channels, channels), jnp.float32) * 0.1
    return w1, w2


def _se_reference(x, w1, w2):
    """Pure-JAX reference mirroring the PyTorch forward."""
    pooled = jnp.mean(x, axis=(2, 3))                 # AdaptiveAvgPool2d(1).flatten(1)
    h = jnp.maximum(pooled @ w1, 0.0)                 # Linear + ReLU
    s = jax.nn.sigmoid(h @ w2)                        # Linear + Sigmoid
    return x * s[:, :, None, None]


if __name__ == "__main__":
    key = jax.random.PRNGKey(0)

    # Case 1: the canonical small shape, single-block fast path.
    B, C, H, W = 2, 4, 16, 16
    kx, kp, key = jax.random.split(key, 3)
    x = jax.random.normal(kx, (B, C, H, W), jnp.float32)
    w1, w2 = make_se_params(C, key=kp)
    y = jax.block_until_ready(se_forward(x, w1, w2))
    y_ref = _se_reference(x, w1, w2)
    assert y.shape == (B, C, H, W)
    assert jnp.allclose(y, y_ref, atol=1e-5, rtol=1e-5), "mismatch vs reference (case 1)"

    # Case 2: ragged B*C and H*W with tiny forced tiles -> exercises the
    # multi-step streaming reduction (pl.when accumulator) and padded tails.
    B2, C2, H2, W2 = 2, 3, 12, 12
    kx2, kp2 = jax.random.split(key)
    x2 = jax.random.normal(kx2, (B2, C2, H2, W2), jnp.float32)
    w1b, w2b = make_se_params(C2, key=kp2)
    y2 = jax.block_until_ready(
        se_forward(x2, w1b, w2b, lane_cap=128, block_bytes=4096))
    y2_ref = _se_reference(x2, w1b, w2b)
    assert y2.shape == (B2, C2, H2, W2)
    assert jnp.allclose(y2, y2_ref, atol=1e-5, rtol=1e-5), "mismatch vs reference (case 2)"

    print("KERNEL_OK")
</pallas_src>

<mosaic_0001>
module attributes {stable_mosaic.version = 11 : i64} {
  func.func @_pool_sum_kernel(%arg0: i32, %arg1: i32, %arg2: memref<8x256xf32, #tpu.memory_space<vmem>>, %arg3: memref<8x1xf32, #tpu.memory_space<vmem>>) attributes {dimension_semantics = [#tpu.dimension_semantics<parallel>, #tpu.dimension_semantics<arbitrary>], iteration_bounds = array<i64: 1, 1>, scalar_prefetch = 0 : i64, scratch_operands = 0 : i64, tpu.core_type = #tpu.core_type<tc>, window_params = [{transform_indices = @transform_0, window_bounds = array<i64: 8, 256>}, {transform_indices = @transform_1, window_bounds = array<i64: 8, 1>}]} {
    %c0_i32 = arith.constant 0 : i32
    %0 = arith.cmpi eq, %arg1, %c0_i32 : i32
    %1 = arith.extui %0 : i1 to i32
    %c0_i32_0 = arith.constant 0 : i32
    %2 = arith.cmpi ne, %1, %c0_i32_0 : i32
    scf.if %2 {
      %cst_6 = arith.constant 0.000000e+00 : f32
      %9 = vector.broadcast %cst_6 : f32 to vector<8x1xf32>
      %c0_7 = arith.constant 0 : index
      %c0_8 = arith.constant 0 : index
      %10 = vector.load %arg3[%c0_7, %c0_8] : memref<8x1xf32, #tpu.memory_space<vmem>>, vector<8x1xf32>
      tpu.vector_store %arg3[%c0_7, %c0_8], %9 {strides = array<i32>} : memref<8x1xf32, #tpu.memory_space<vmem>>, vector<8x1xf32>,
    } else {
    }
    %c0 = arith.constant 0 : index
    %c0_1 = arith.constant 0 : index
    %3 = vector.load %arg3[%c0, %c0_1] : memref<8x1xf32, #tpu.memory_space<vmem>>, vector<8x1xf32>
    %c0_2 = arith.constant 0 : index
    %c0_3 = arith.constant 0 : index
    %4 = vector.load %arg2[%c0_2, %c0_3] : memref<8x256xf32, #tpu.memory_space<vmem>>, vector<8x256xf32>
    %cst = arith.constant dense<0.000000e+00> : vector<8xf32>
    %5 = vector.multi_reduction <add>, %4, %cst [1] : vector<8x256xf32> to vector<8xf32>
    %6 = vector.shape_cast %5 : vector<8xf32> to vector<8x1xf32>
    %7 = arith.addf %3, %6 : vector<8x1xf32>
    %c0_4 = arith.constant 0 : index
    %c0_5 = arith.constant 0 : index
    %8 = vector.load %arg3[%c0_4, %c0_5] : memref<8x1xf32, #tpu.memory_space<vmem>>, vector<8x1xf32>
    tpu.vector_store %arg3[%c0_4, %c0_5], %7 {strides = array<i32>} : memref<8x1xf32, #tpu.memory_space<vmem>>, vector<8x1xf32>,
    return
  }
  func.func @transform_0(%arg0: i32, %arg1: i32) -> (i32, i32) {
    %c0_i32 = arith.constant 0 : i32
    return %arg0, %arg1 : i32, i32
  }
  func.func @transform_1(%arg0: i32, %arg1: i32) -> (i32, i32) {
    %c0_i32 = arith.constant 0 : i32
    %c0_i32_0 = arith.constant 0 : i32
    return %arg0, %c0_i32 : i32, i32
  }
}

</mosaic_0001>

<bundles_post_ra>
// kernel: tpu_custom_call.1
= control target key start
LH: loop header
LB: loop body
LE: loop exit
PB: predicated region body
PF: predicated region fallthrough
CT: control target
= control target key end

     0   :  { %6 = vsyncpa [#allocation3], 0  ;;  %s66_s6 = smov [#allocation2]   ;;  %s99_s0 = inlined_call_operand.hbm [shape: f32[8,256], index: 0, kind: input, shape index: {}]   ;;  %s100_s1 = inlined_call_operand.vmem [shape: f32[8,1], index: 1, kind: output, shape index: {}]  }
   0x1   :  { %s13_s7 = sshll.u32 %s66_s6, 4  ;;  %s42_s10 = scalar_lea.hbm %s99_s0, 256  ;;  %s14_s7 = int_to_ptr.vmem [resolvable:$true] %s13_s7 }
   0x2   :  { %p43_p0 = scmp.ne.s32.totalorder %s99_s0, %s42_s10  ;;  %p46_p1 = scmp.lt.u32.totalorder %s42_s10, %s99_s0 }
   0x4   :  { %p48_p2 = pnand %p46_p1, %p43_p0 }
   0x6   :  { %51 = shalt.err (!%p48_p2)
}
   0x7   :  { %s52_s15 = scalar_lea.vmem %s14_s7, 256  ;;  %p57_p4 = scmp.lt.s32.totalorder %s14_s7, %s14_s7 }
   0x8   :  { %p53_p3 = scmp.ne.s32.totalorder %s14_s7, %s52_s15  ;;  %p58_p5 = scmp.lt.s32.totalorder %s52_s15, %s52_s15 }
   0xa   :  { %p59_p6 = por %p58_p5, %p57_p4 }
   0xc   :  { %p60_p7 = pnand %p59_p6, %p53_p3 }
   0xe   :  { %63 = shalt.err (!%p60_p7)
}
   0xf   :  { %16 = dma.hbm_to_vmem [thread:$0]  %s99_s0, 256, %s14_s7, [#allocation3]  }
  0x10   :  { %64 = dma.done.wait [#allocation3], 256  }
  0x11   :  { %65 = vsyncadd [#allocation3], 4294967040  ;;  %vm24_vm0 = vcmask 7168   ;;  %v67_v0 = vmov 0.0   ;;  %v27_v1 = vld [vmem:[#allocation2] sm:$0xff]  ;;  %v28_v2 = vld [vmem:[#allocation2 + $0x8] sm:$0xff] }
  0x12   :  { %25 = vst.msk [vmem:[%s100_s1] sm:$0xff] %vm24_vm0, %v67_v0  ;;  %v29_v3 = vadd.f32 %v28_v2, %v27_v1 }
  0x14   :  { %30 = vadd.xlane.f32.xlu0 %v29_v3 }
  0x19   :  { %v26_v4 = vld [vmem:[%s100_s1] sm:$0xff] }
  0xa1   :  { %v31_v5 = vpop.xlane.xlu0 %30 }
  0xa2   :  { %v32_v6 = vadd.f32 %v31_v5, %v26_v4 }
  0xa4   :  { %34 = vst.msk [vmem:[%s100_s1] sm:$0xff] %vm24_vm0, %v32_v6 }
  0xa5   :  { %39 = vsyncpa [#allocation3], 1 }

</bundles_post_ra>
